<compile_context>
chip_gen: v7x
topology: tpu7x:2x2x1
jax: 0.10.0
libtpu: 0.0.40
codegen_flags: <defaults>
</compile_context>

<pallas_src>
import jax
import jax.numpy as jnp
from jax.experimental import pallas as pl
from jax.experimental.pallas import tpu as pltpu

_LANE = 128
_TARGET_TILE_BYTES = 4 * 1024 * 1024  # per-buffer budget (see header comment)


def _chomp_kernel(x_ref, o_ref):
    # Static slice along the last axis; a no-op (full slice) on the lane-tiled
    # path where the in/out block shapes already match.
    o_ref[...] = x_ref[:, : o_ref.shape[-1]]


def _sublane_multiple(itemsize: int) -> int:
    # Packed sublane granularity: f32 -> 8, bf16/f16 -> 16, int8/fp8 -> 32.
    return max(8, 32 // itemsize)


def _row_tile(rows: int, budget_rows: int, sub: int) -> int:
    if budget_rows >= rows or rows <= sub:
        return rows  # equal-to-full-dim is always a legal block dim
    return max(sub, (budget_rows // sub) * sub)


def _choose_tiles(rows, l_in, l_out, itemsize, target_bytes=_TARGET_TILE_BYTES):
    """Return (row_tile, lane_tile, in_len).

    lane_tile is None on the short-sequence path (L_out < 128); there the input
    block is `in_len` wide (128 if L_in allows, else full L_in) and the chomp is
    a static in-kernel slice.
    """
    sub = _sublane_multiple(itemsize)

    if l_out < _LANE:
        in_len = _LANE if l_in >= _LANE else l_in
        tr = _row_tile(rows, target_bytes // max(1, in_len * itemsize), sub)
        return tr, None, in_len

    # Lane tile: multiple of 128, <= L_out, as wide as the budget allows for a
    # single sublane group; remaining budget stacks more row groups.
    max_tl = (l_out // _LANE) * _LANE
    tl = min(max_tl,
             max(_LANE, (target_bytes // (sub * itemsize)) // _LANE * _LANE))
    tr = _row_tile(rows, target_bytes // (tl * itemsize), sub)
    return tr, tl, tl


def chomp1d(x: jax.Array, chomp_size: int) -> jax.Array:
    """Pallas equivalent of Chomp1d.forward: x[:, :, :-chomp_size].contiguous()."""
    assert chomp_size > 0, "chomp_size must be positive (matches x[:, :, :-k])"
    n, c, l_in = x.shape
    l_out = l_in - chomp_size
    assert l_out > 0, "chomp_size must be smaller than the sequence length"

    rows = n * c
    itemsize = x.dtype.itemsize
    x2 = x.reshape(rows, l_in)  # free for a contiguous NCL array

    tr, tl, in_len = _choose_tiles(rows, l_in, l_out, itemsize)

    if tl is None:
        # Short-sequence path: full (or 128-wide) input block, in-kernel slice.
        grid = (pl.cdiv(rows, tr),)
        in_specs = [pl.BlockSpec((tr, in_len), lambda r: (r, 0))]
        out_specs = pl.BlockSpec((tr, l_out), lambda r: (r, 0))
        semantics = ("parallel",)
        out_tile_len = l_out
    else:
        # Lane-tiled path: identical block shapes / index maps, pure copy body;
        # the final partial L block is edge-masked by Pallas.
        grid = (pl.cdiv(rows, tr), pl.cdiv(l_out, tl))
        in_specs = [pl.BlockSpec((tr, tl), lambda r, l: (r, l))]
        out_specs = pl.BlockSpec((tr, tl), lambda r, l: (r, l))
        semantics = ("parallel", "parallel")
        out_tile_len = tl

    # Explicit scoped-VMEM limit covering the double-buffered working set with
    # headroom; stays well under every generation's physical VMEM (>= 64 MiB),
    # and above v5e's 16 MiB scoped default when tiles are enlarged.
    tile_bytes = tr * (in_len + out_tile_len) * itemsize
    vmem_limit = int(min(32 * 1024 * 1024,
                         max(16 * 1024 * 1024, 2 * tile_bytes + 2 * 1024 * 1024)))

    copy_bytes = 2 * rows * l_out * itemsize  # read kept region + write output

    out2 = pl.pallas_call(
        _chomp_kernel,
        out_shape=jax.ShapeDtypeStruct((rows, l_out), x.dtype),
        grid=grid,
        in_specs=in_specs,
        out_specs=out_specs,
        compiler_params=pltpu.CompilerParams(
            dimension_semantics=semantics,
            vmem_limit_bytes=vmem_limit,
        ),
        cost_estimate=pl.CostEstimate(
            flops=0, transcendentals=0, bytes_accessed=copy_bytes),
    )(x2)
    return out2.reshape(n, c, l_out)


if __name__ == "__main__":
    key = jax.random.PRNGKey(0)
    k1, k2 = jax.random.split(key)

    # Case 1: small TCN-like shape -> short-sequence path (in-kernel slice).
    N, C, L, chomp = 2, 4, 16, 3
    x = jax.random.normal(k1, (N, C, L), dtype=jnp.float32)
    out = jax.block_until_ready(chomp1d(x, chomp))
    ref = x[:, :, :-chomp]
    assert out.shape == (N, C, L - chomp), out.shape
    assert out.dtype == x.dtype
    assert jnp.array_equal(out, ref), "chomp mismatch (short-sequence path)"

    # Case 2: longer sequence -> lane-tiled path with an L grid axis
    # (L_out = 192 -> TL = 128, last L block partial / edge-masked).
    N2, C2, L2, chomp2 = 2, 4, 200, 8
    x2 = jax.random.normal(k2, (N2, C2, L2), dtype=jnp.float32)
    out2 = jax.block_until_ready(chomp1d(x2, chomp2))
    ref2 = x2[:, :, :-chomp2]
    assert out2.shape == ref2.shape
    assert jnp.array_equal(out2, ref2), "chomp mismatch (lane-tiled path)"

    # Case 3: bf16 exercises the dtype-aware sublane tiling (multiple of 16).
    N3, C3, L3, chomp3 = 4, 8, 384, 2
    x3 = jax.random.normal(jax.random.PRNGKey(0), (N3, C3, L3), dtype=jnp.bfloat16)
    out3 = jax.block_until_ready(chomp1d(x3, chomp3))
    ref3 = x3[:, :, :-chomp3]
    assert out3.shape == ref3.shape
    assert jnp.array_equal(out3, ref3), "chomp mismatch (bf16 path)"

    print("KERNEL_OK")
</pallas_src>

<mosaic_0001>
module attributes {stable_mosaic.version = 11 : i64} {
  func.func @_chomp_kernel(%arg0: i32, %arg1: memref<8x16xf32, #tpu.memory_space<vmem>>, %arg2: memref<8x13xf32, #tpu.memory_space<vmem>>) attributes {dimension_semantics = [#tpu.dimension_semantics<parallel>], iteration_bounds = array<i64: 1>, scalar_prefetch = 0 : i64, scratch_operands = 0 : i64, tpu.core_type = #tpu.core_type<tc>, window_params = [{transform_indices = @transform_0, window_bounds = array<i64: 8, 16>}, {transform_indices = @transform_1, window_bounds = array<i64: 8, 13>}]} {
    %c0 = arith.constant 0 : index
    %c0_0 = arith.constant 0 : index
    %0 = vector.load %arg1[%c0, %c0_0] : memref<8x16xf32, #tpu.memory_space<vmem>>, vector<8x13xf32>
    %c0_1 = arith.constant 0 : index
    %c0_2 = arith.constant 0 : index
    %1 = vector.load %arg2[%c0_1, %c0_2] : memref<8x13xf32, #tpu.memory_space<vmem>>, vector<8x13xf32>
    tpu.vector_store %arg2[%c0_1, %c0_2], %0 {strides = array<i32>} : memref<8x13xf32, #tpu.memory_space<vmem>>, vector<8x13xf32>,
    return
  }
  func.func @transform_0(%arg0: i32) -> (i32, i32) {
    %c0_i32 = arith.constant 0 : i32
    %c0_i32_0 = arith.constant 0 : i32
    return %arg0, %c0_i32 : i32, i32
  }
  func.func @transform_1(%arg0: i32) -> (i32, i32) {
    %c0_i32 = arith.constant 0 : i32
    %c0_i32_0 = arith.constant 0 : i32
    return %arg0, %c0_i32 : i32, i32
  }
}

</mosaic_0001>

<bundles_post_ra>
// kernel: tpu_custom_call.1
= control target key start
LH: loop header
LB: loop body
LE: loop exit
PB: predicated region body
PF: predicated region fallthrough
CT: control target
= control target key end

     0   :  { %6 = vsyncpa [#allocation3], 0  ;;  %s125_s0 = inlined_call_operand.hbm [shape: f32[8,16], index: 0, kind: input, shape index: {}]   ;;  %s126_s1 = inlined_call_operand.hbm [shape: f32[8,13], index: 1, kind: output, shape index: {}]  }
   0x1   :  { %7 = vsyncpa [#allocation4], 0  ;;  %s89_s6 = smov [#allocation2]   ;;  %s41_s10 = scalar_lea.hbm %s125_s0, 128 }
   0x2   :  { %s14_s7 = sshll.u32 %s89_s6, 4  ;;  %p42_p0 = scmp.ne.s32.totalorder %s125_s0, %s41_s10  ;;  %s15_s7 = int_to_ptr.vmem [resolvable:$true] %s14_s7 }
   0x3   :  { %p45_p1 = scmp.lt.u32.totalorder %s41_s10, %s125_s0 }
   0x5   :  { %p47_p2 = pnand %p45_p1, %p42_p0 }
   0x7   :  { %50 = shalt.err (!%p47_p2)
}
   0x8   :  { %s51_s15 = scalar_lea.vmem %s15_s7, 128  ;;  %p56_p4 = scmp.lt.s32.totalorder %s15_s7, %s15_s7 }
   0x9   :  { %p52_p3 = scmp.ne.s32.totalorder %s15_s7, %s51_s15  ;;  %p57_p5 = scmp.lt.s32.totalorder %s51_s15, %s51_s15 }
   0xb   :  { %p58_p6 = por %p57_p5, %p56_p4 }
   0xd   :  { %p59_p7 = pnand %p58_p6, %p52_p3 }
   0xf   :  { %62 = shalt.err (!%p59_p7)
}
  0x10   :  { %17 = dma.hbm_to_vmem [thread:$0]  %s125_s0, 128, %s15_s7, [#allocation3]  }
  0x11   :  { %85 = dma.done.wait [#allocation3], 128  }
  0x12   :  { %86 = vsyncadd [#allocation3], 4294967168  ;;  %s90_s18 = smov [#allocation5]   ;;  %vm22_vm0 = vcmask 105472   ;;  %v21_v0 = vld [vmem:[#allocation2] sm:$0xff] }
  0x13   :  { %s30_s19 = sshll.u32 %s90_s18, 4  ;;  %23 = vst.msk [vmem:[#allocation5] sm:$0xff] %vm22_vm0, %v21_v0  ;;  %s31_s19 = int_to_ptr.vmem [resolvable:$true] %s30_s19 }
  0x14   :  { %s63_s20 = scalar_lea.vmem %s31_s19, 128  ;;  %p68_p9 = scmp.lt.s32.totalorder %s31_s19, %s31_s19 }
  0x15   :  { %p64_p8 = scmp.ne.s32.totalorder %s31_s19, %s63_s20  ;;  %p69_p10 = scmp.lt.s32.totalorder %s63_s20, %s63_s20 }
  0x17   :  { %p70_p11 = por %p69_p10, %p68_p9 }
  0x19   :  { %p71_p12 = pnand %p70_p11, %p64_p8 }
  0x1b   :  { %74 = shalt.err (!%p71_p12)
}
  0x1c   :  { %s75_s23 = scalar_lea.hbm %s126_s1, 128 }
  0x1d   :  { %p76_p13 = scmp.ne.s32.totalorder %s126_s1, %s75_s23  ;;  %p79_p0 = scmp.lt.u32.totalorder %s75_s23, %s126_s1 }
  0x1f   :  { %p81_p1 = pnand %p79_p0, %p76_p13 }
  0x21   :  { %84 = shalt.err (!%p81_p1)
}
  0x22   :  { %33 = dma.vmem_to_hbm [thread:$0]  %s31_s19, 128, %s126_s1, [#allocation4]  }
  0x23   :  { %87 = dma.done.wait [#allocation4], 128  }
  0x24   :  { %88 = vsyncadd [#allocation4], 4294967168 }
  0x25   :  { %37 = vsyncpa [#allocation3], 1 }
  0x26   :  { %38 = vsyncpa [#allocation4], 1 }

</bundles_post_ra>
